<compile_context>
chip_gen: v5e
topology: v5e:2x2
jax: 0.10.0
libtpu: 0.0.40
codegen_flags: <defaults>
</compile_context>

<pallas_src>
import jax
import jax.numpy as jnp
from jax.experimental import pallas as pl
from jax.experimental.pallas import tpu as pltpu

LN_EPS = 1e-5  # PyTorch nn.LayerNorm default


def _round_up(x, m):
    return (x + m - 1) // m * m


def _self_output_kernel(h_ref, inp_ref, w_ref, p_ref, o_ref):
    # h_ref:   (tm, H)  attention-output rows (native dtype -> MXU directly)
    # inp_ref: (tm, H)  residual rows
    # w_ref:   (H, H)   dense weight, pre-transposed to [in, out] (native dtype)
    # p_ref:   (3, H)   packed f32 params: [dense_bias; ln_gamma; ln_beta]
    # o_ref:   (tm, H)  output rows
    bias = p_ref[0:1, :]
    gamma = p_ref[1:2, :]
    beta = p_ref[2:3, :]

    # Dense layer on the MXU; no operand casts (bf16 x bf16 -> f32 is the
    # native fast path), accumulate in f32.
    y = jnp.dot(h_ref[...], w_ref[...], preferred_element_type=jnp.float32)

    # TODO(synk): training-mode StableDropout (scaled PRNG mask) omitted;
    # eval-mode dropout is the identity.

    # Bias + residual add in f32.
    s = y + bias + inp_ref[...].astype(jnp.float32)

    # LayerNorm over the hidden dim, single-pass moments (one fewer XLU
    # reduction per tile than the two-pass form).
    mean = jnp.mean(s, axis=-1, keepdims=True)
    msq = jnp.mean(s * s, axis=-1, keepdims=True)
    var = jnp.maximum(msq - mean * mean, 0.0)
    normed = (s - mean) * jax.lax.rsqrt(var + LN_EPS)   # rsqrt -> EUP slot

    o_ref[...] = (normed * gamma + beta).astype(o_ref.dtype)


def deberta_v2_self_output(hidden_states, input_tensor, dense_weight_t,
                           dense_bias, ln_gamma, ln_beta, *, row_tile=512):
    """Fused dense + residual + LayerNorm (DebertaV2SelfOutput forward, eval).

    hidden_states, input_tensor: [B, S, H]
    dense_weight_t: [H_in, H_out] -- i.e. PyTorch `dense.weight.T`, transposed
        ONCE by the caller (keep the weight stored pre-transposed in
        production, and in bf16 for the MXU fast path).
    dense_bias, ln_gamma, ln_beta: [H]
    """
    B, S, H = hidden_states.shape
    M = B * S

    # ---- pick the row tile against a VMEM budget ----------------------------
    # double-buffered (h, residual, out) blocks + resident weight + params must
    # stay well under the scoped VMEM limit (48 MiB below, v7x-physical safe).
    act_bytes = jnp.dtype(hidden_states.dtype).itemsize
    w_bytes = jnp.dtype(dense_weight_t.dtype).itemsize
    budget = 40 * 1024 * 1024
    resident = 2 * H * H * w_bytes + 2 * 3 * H * 4      # weight + packed params
    per_row = 2 * 3 * H * act_bytes                      # 2 bufs x (h, inp, out)
    max_tile = max(8, (budget - resident) // max(per_row, 1))
    tile = min(row_tile, max_tile, _round_up(M, 8))
    tile = max(8, (tile // 8) * 8)

    h2 = hidden_states.reshape(M, H)
    i2 = input_tensor.reshape(M, H)

    # Pack + pre-cast the small per-channel params once (hoists casts out of
    # the kernel, collapses 3 tiny per-step operands into one resident block).
    params = jnp.stack(
        [dense_bias.astype(jnp.float32),
         ln_gamma.astype(jnp.float32),
         ln_beta.astype(jnp.float32)],
        axis=0,
    )  # (3, H)

    grid = (pl.cdiv(M, tile),)   # ragged edge block is masked by Pallas

    out = pl.pallas_call(
        _self_output_kernel,
        out_shape=jax.ShapeDtypeStruct((M, H), hidden_states.dtype),
        grid_spec=pltpu.PrefetchScalarGridSpec(
            num_scalar_prefetch=0,
            grid=grid,
            in_specs=[
                pl.BlockSpec((tile, H), lambda i: (i, 0)),  # hidden rows
                pl.BlockSpec((tile, H), lambda i: (i, 0)),  # residual rows
                pl.BlockSpec((H, H), lambda i: (0, 0)),     # weight (constant idx -> resident)
                pl.BlockSpec((3, H), lambda i: (0, 0)),     # packed bias/gamma/beta
            ],
            out_specs=pl.BlockSpec((tile, H), lambda i: (i, 0)),
        ),
        compiler_params=pltpu.CompilerParams(
            dimension_semantics=("parallel",),   # row axis shards across TCs (v7x megacore)
            vmem_limit_bytes=48 * 1024 * 1024,   # big row tile + resident weight, v7x-safe
        ),
    )(h2, i2, dense_weight_t, params)

    return out.reshape(B, S, H)


def _reference(hidden_states, input_tensor, dense_weight, dense_bias,
               ln_gamma, ln_beta):
    # dense_weight is PyTorch-layout [out, in].
    y = jnp.einsum("bsh,oh->bso", hidden_states, dense_weight) + dense_bias
    s = y + input_tensor
    mean = jnp.mean(s, axis=-1, keepdims=True)
    var = jnp.mean((s - mean) ** 2, axis=-1, keepdims=True)
    return (s - mean) / jnp.sqrt(var + LN_EPS) * ln_gamma + ln_beta


if __name__ == "__main__":
    B, S, H = 2, 8, 32

    key = jax.random.PRNGKey(0)
    k_h, k_i, k_w, k_b, k_g, k_beta = jax.random.split(key, 6)

    hidden_states = jax.random.normal(k_h, (B, S, H), dtype=jnp.float32)
    input_tensor = jax.random.normal(k_i, (B, S, H), dtype=jnp.float32)

    # nn.Linear(H, H) weight in PyTorch [out, in] layout + nn.LayerNorm(H) params.
    dense_weight = jax.random.normal(k_w, (H, H), dtype=jnp.float32) * (1.0 / jnp.sqrt(H))
    dense_bias = jax.random.normal(k_b, (H,), dtype=jnp.float32) * 0.02
    ln_gamma = 1.0 + 0.1 * jax.random.normal(k_g, (H,), dtype=jnp.float32)
    ln_beta = 0.1 * jax.random.normal(k_beta, (H,), dtype=jnp.float32)

    # Transpose the weight ONCE outside the hot path (production: store it this way).
    dense_weight_t = jnp.asarray(dense_weight.T)

    out = deberta_v2_self_output(hidden_states, input_tensor, dense_weight_t,
                                 dense_bias, ln_gamma, ln_beta)
    out = jax.block_until_ready(out)

    ref = _reference(hidden_states, input_tensor, dense_weight, dense_bias,
                     ln_gamma, ln_beta)
    assert out.shape == (B, S, H)
    assert jnp.allclose(out, ref, atol=1e-4, rtol=1e-4), "mismatch vs JAX reference"

    print("KERNEL_OK")
</pallas_src>

<mosaic_0001>
module attributes {stable_mosaic.version = 11 : i64} {
  func.func @_self_output_kernel(%arg0: i32, %arg1: memref<16x32xf32, #tpu.memory_space<vmem>>, %arg2: memref<16x32xf32, #tpu.memory_space<vmem>>, %arg3: memref<32x32xf32, #tpu.memory_space<vmem>>, %arg4: memref<3x32xf32, #tpu.memory_space<vmem>>, %arg5: memref<16x32xf32, #tpu.memory_space<vmem>>) attributes {dimension_semantics = [#tpu.dimension_semantics<parallel>], iteration_bounds = array<i64: 1>, scalar_prefetch = 0 : i64, scratch_operands = 0 : i64, tpu.core_type = #tpu.core_type<tc>, window_params = [{transform_indices = @transform_0, window_bounds = array<i64: 16, 32>}, {transform_indices = @transform_1, window_bounds = array<i64: 16, 32>}, {pipeline_mode = #tpu.pipeline_mode<synchronous>, transform_indices = @transform_2, window_bounds = array<i64: 32, 32>}, {pipeline_mode = #tpu.pipeline_mode<synchronous>, transform_indices = @transform_3, window_bounds = array<i64: 3, 32>}, {transform_indices = @transform_4, window_bounds = array<i64: 16, 32>}]} {
    %c0 = arith.constant 0 : index
    %c0_0 = arith.constant 0 : index
    %0 = vector.load %arg4[%c0, %c0_0] : memref<3x32xf32, #tpu.memory_space<vmem>>, vector<1x32xf32>
    %c1 = arith.constant 1 : index
    %c0_1 = arith.constant 0 : index
    %1 = vector.load %arg4[%c1, %c0_1] : memref<3x32xf32, #tpu.memory_space<vmem>>, vector<1x32xf32>
    %c2 = arith.constant 2 : index
    %c0_2 = arith.constant 0 : index
    %2 = vector.load %arg4[%c2, %c0_2] : memref<3x32xf32, #tpu.memory_space<vmem>>, vector<1x32xf32>
    %c0_3 = arith.constant 0 : index
    %c0_4 = arith.constant 0 : index
    %3 = vector.load %arg1[%c0_3, %c0_4] : memref<16x32xf32, #tpu.memory_space<vmem>>, vector<16x32xf32>
    %c0_5 = arith.constant 0 : index
    %c0_6 = arith.constant 0 : index
    %4 = vector.load %arg3[%c0_5, %c0_6] : memref<32x32xf32, #tpu.memory_space<vmem>>, vector<32x32xf32>
    %cst = arith.constant dense<0.000000e+00> : vector<16x32xf32>
    %5 = tpu.matmul %3, %4, %cst {dimension_numbers = #tpu.dot_dimension_numbers<[1], [0], [0], [1], [0, 0, 1, 1], [], []>} : vector<16x32xf32>, vector<32x32xf32>, vector<16x32xf32> -> vector<16x32xf32>
    %6 = vector.broadcast %0 : vector<1x32xf32> to vector<16x32xf32>
    %7 = arith.addf %5, %6 : vector<16x32xf32>
    %c0_7 = arith.constant 0 : index
    %c0_8 = arith.constant 0 : index
    %8 = vector.load %arg2[%c0_7, %c0_8] : memref<16x32xf32, #tpu.memory_space<vmem>>, vector<16x32xf32>
    %9 = arith.addf %7, %8 : vector<16x32xf32>
    %cst_9 = arith.constant dense<0.000000e+00> : vector<16xf32>
    %10 = vector.multi_reduction <add>, %9, %cst_9 [1] : vector<16x32xf32> to vector<16xf32>
    %11 = vector.shape_cast %10 : vector<16xf32> to vector<16x1xf32>
    %cst_10 = arith.constant 3.200000e+01 : f32
    %12 = vector.broadcast %cst_10 : f32 to vector<16x1xf32>
    %13 = arith.divf %11, %12 : vector<16x1xf32>
    %14 = arith.mulf %9, %9 : vector<16x32xf32>
    %cst_11 = arith.constant dense<0.000000e+00> : vector<16xf32>
    %15 = vector.multi_reduction <add>, %14, %cst_11 [1] : vector<16x32xf32> to vector<16xf32>
    %16 = vector.shape_cast %15 : vector<16xf32> to vector<16x1xf32>
    %cst_12 = arith.constant 3.200000e+01 : f32
    %17 = vector.broadcast %cst_12 : f32 to vector<16x1xf32>
    %18 = arith.divf %16, %17 : vector<16x1xf32>
    %19 = arith.mulf %13, %13 : vector<16x1xf32>
    %20 = arith.subf %18, %19 : vector<16x1xf32>
    %cst_13 = arith.constant 0.000000e+00 : f32
    %21 = vector.broadcast %cst_13 : f32 to vector<16x1xf32>
    %22 = arith.maximumf %20, %21 : vector<16x1xf32>
    %23 = vector.broadcast %13 : vector<16x1xf32> to vector<16x32xf32>
    %24 = arith.subf %9, %23 : vector<16x32xf32>
    %cst_14 = arith.constant 9.99999974E-6 : f32
    %25 = vector.broadcast %cst_14 : f32 to vector<16x1xf32>
    %26 = arith.addf %22, %25 : vector<16x1xf32>
    %27 = math.rsqrt %26 : vector<16x1xf32>
    %28 = vector.broadcast %27 : vector<16x1xf32> to vector<16x32xf32>
    %29 = arith.mulf %24, %28 : vector<16x32xf32>
    %30 = vector.broadcast %1 : vector<1x32xf32> to vector<16x32xf32>
    %31 = arith.mulf %29, %30 : vector<16x32xf32>
    %32 = vector.broadcast %2 : vector<1x32xf32> to vector<16x32xf32>
    %33 = arith.addf %31, %32 : vector<16x32xf32>
    %c0_15 = arith.constant 0 : index
    %c0_16 = arith.constant 0 : index
    %34 = vector.load %arg5[%c0_15, %c0_16] : memref<16x32xf32, #tpu.memory_space<vmem>>, vector<16x32xf32>
    tpu.vector_store %arg5[%c0_15, %c0_16], %33 {strides = array<i32>} : memref<16x32xf32, #tpu.memory_space<vmem>>, vector<16x32xf32>,
    return
  }
  func.func @transform_0(%arg0: i32) -> (i32, i32) {
    %c0_i32 = arith.constant 0 : i32
    %c0_i32_0 = arith.constant 0 : i32
    return %arg0, %c0_i32 : i32, i32
  }
  func.func @transform_1(%arg0: i32) -> (i32, i32) {
    %c0_i32 = arith.constant 0 : i32
    %c0_i32_0 = arith.constant 0 : i32
    return %arg0, %c0_i32 : i32, i32
  }
  func.func @transform_2(%arg0: i32) -> (i32, i32) {
    %c0_i32 = arith.constant 0 : i32
    %c0_i32_0 = arith.constant 0 : i32
    %c0_i32_1 = arith.constant 0 : i32
    return %c0_i32, %c0_i32_0 : i32, i32
  }
  func.func @transform_3(%arg0: i32) -> (i32, i32) {
    %c0_i32 = arith.constant 0 : i32
    %c0_i32_0 = arith.constant 0 : i32
    %c0_i32_1 = arith.constant 0 : i32
    return %c0_i32, %c0_i32_0 : i32, i32
  }
  func.func @transform_4(%arg0: i32) -> (i32, i32) {
    %c0_i32 = arith.constant 0 : i32
    %c0_i32_0 = arith.constant 0 : i32
    return %arg0, %c0_i32 : i32, i32
  }
}

</mosaic_0001>

<bundles_post_ra>
// kernel: tpu_custom_call.1
= control target key start
LH: loop header
LB: loop body
LE: loop exit
PB: predicated region body
PF: predicated region fallthrough
CT: control target
= control target key end

     0   :  { %9 = vsyncpa [#allocation3], 0  ;;  %s434_s0 = inlined_call_operand.hbm [shape: f32[16,32], index: 0, kind: input, shape index: {}]   ;;  %s435_s1 = inlined_call_operand.hbm [shape: f32[16,32], index: 1, kind: input, shape index: {}]   ;;  %s436_s2 = inlined_call_operand.hbm [shape: f32[32,32], index: 2, kind: input, shape index: {}]   ;;  %s437_s3 = inlined_call_operand.hbm [shape: f32[3,32], index: 3, kind: input, shape index: {}]   ;;  %s438_s4 = inlined_call_operand.hbm [shape: f32[16,32], index: 4, kind: output, shape index: {}]  }
   0x1   :  { %10 = vsyncpa [#allocation6], 0 }
   0x2   :  { %11 = vsyncpa [#allocation9], 0 }
   0x3   :  { %12 = vsyncpa [#allocation4], 0  ;;  %s30_s17 = sshll.u32 %s435_s1, 4  ;;  %s360_s18 = smov [#allocation5]   ;;  %s31_s17 = int_to_ptr.hbm [resolvable:$true] %s30_s17 }
   0x4   :  { %s32_s19 = sshll.u32 %s360_s18, 4  ;;  %s17_s22 = sshll.u32 %s434_s0, 4  ;;  %s33_s19 = int_to_ptr.vmem [resolvable:$true] %s32_s19  ;;  %s18_s22 = int_to_ptr.hbm [resolvable:$true] %s17_s22 }
   0x5   :  { %s361_s23 = smov 128   ;;  %s362_s24 = smov 8  }
   0x6   :  { %38 = dma.hbm_to_vmem [thread:$0]  %s31_s17, 256, %s33_s19, [#allocation6], %s361_s23, %s361_s23, %s362_s24  }
   0x7   :  { %s363_s25 = smov [#allocation2]   ;;  %s43_s1 = sshll.u32 %s436_s2, 4  ;;  %s44_s1 = int_to_ptr.hbm [resolvable:$true] %s43_s1 }
   0x8   :  { %s19_s26 = sshll.u32 %s363_s25, 4  ;;  %s57_s30 = sshll.u32 %s437_s3, 4  ;;  %s20_s26 = int_to_ptr.vmem [resolvable:$true] %s19_s26  ;;  %s58_s30 = int_to_ptr.hbm [resolvable:$true] %s57_s30 }
   0x9   :  { %25 = dma.hbm_to_vmem [thread:$0]  %s18_s22, 256, %s20_s26, [#allocation3], %s361_s23, %s361_s23, %s362_s24  }
   0xa   :  { %s364_s5 = smov [#allocation7]   ;;  %s365_s7 = smov [#allocation8]  }
   0xb   :  { %s45_s6 = sshll.u32 %s364_s5, 4  ;;  %s59_s2 = sshll.u32 %s365_s7, 4  ;;  %s46_s6 = int_to_ptr.vmem [resolvable:$true] %s45_s6  ;;  %s60_s2 = int_to_ptr.vmem [resolvable:$true] %s59_s2 }
   0xc   :  { %51 = dma.hbm_to_vmem [thread:$0]  %s44_s1, 512, %s46_s6, [#allocation6], %s361_s23, %s361_s23, %s362_s24  }
   0xd   :  { %62 = dma.hbm_to_vmem [thread:$0]  %s58_s30, 64, %s60_s2, [#allocation9]  }
   0xe   :  { %352 = dma.done.wait [#allocation3], 256  }
   0xf   :  { %353 = vsyncadd [#allocation3], 4294967040 }
  0x10   :  { %354 = dma.done.wait [#allocation6], 768  }
  0x11   :  { %355 = vsyncadd [#allocation6], 4294966528 }
  0x12   :  { %356 = dma.done.wait [#allocation9], 64  }
  0x13   :  { %357 = vsyncadd [#allocation9], 4294967232  ;;  %v87_v0 = vld [vmem:[#allocation7 + $0x18] sm:$0xff]  ;;  %v86_v1 = vld [vmem:[#allocation7 + $0x10] sm:$0xff]  ;;  %vm89_vm0 = vcmask 261120   ;;  %v366_v21 = vmov 32.0  }
  0x14   :  { %108 = vmatpush.msra.mxu0 %v87_v0  ;;  %211 = vmatpush.msra.mxu1 %v87_v0  ;;  %v85_v2 = vld [vmem:[#allocation7 + $0x8] sm:$0xff]  ;;  %v84_v3 = vld [vmem:[#allocation7] sm:$0xff]  ;;  %v119_v8 = vld [vmem:[#allocation5] sm:$0xff]  ;;  %226 = vrcp.f32 %v366_v21  ;;  %s367_s3 = smov [#allocation10]   ;;  %s194_s11 = sshll.u32 %s438_s4, 4  ;;  %s195_s11 = int_to_ptr.hbm [resolvable:$true] %s194_s11 }
  0x15   :  { %v82_v4 = vld [vmem:[#allocation2] sm:$0xff]  ;;  %v83_v5 = vld [vmem:[#allocation2 + $0x8] sm:$0xff]  ;;  %v120_v12 = vld [vmem:[#allocation5 + $0x8] sm:$0xff]  ;;  %s192_s8 = sshll.u32 %s367_s3, 4  ;;  %s193_s8 = int_to_ptr.vmem [resolvable:$true] %s192_s8 }
  0x16   :  { %109 = vmatpush.msra.mxu0 %v86_v1  ;;  %212 = vmatpush.msra.mxu1 %v86_v1  ;;  %v223_v6 = vld [vmem:[#allocation8] ss:$0 sm:$0xff]  ;;  %v224_v53 = vld [vmem:[#allocation8 + $0x1] ss:$0 sm:$0xff]  ;;  %v225_v57 = vld [vmem:[#allocation8 + $0x2] ss:$0 sm:$0xff] }
  0x18   :  { %110 = vmatpush.msra.mxu0 %v85_v2  ;;  %213 = vmatpush.msra.mxu1 %v85_v2 }
  0x1a   :  { %111 = vmatpush.msra.mxu0 %v84_v3  ;;  %214 = vmatpush.msra.mxu1 %v84_v3  ;;  %v227_v22 = vpop.eup %226 }
  0x1b   :  { %209 = vmatmul.msk.f32.vlgmr.msra.gmra.mxu0 %vm89_vm0, %v82_v4  ;;  %210 = vmatmul.msk.f32.vlgmr.msra.gmra.mxu1 %vm89_vm0, %v83_v5  ;;  %v130_v23 = vmul.f32 32.0, %v227_v22  ;;  %vm134_vm1 = vweird.f32 %v227_v22 }
  0x1d   :  { %v131_v24 = vsub.f32 1.0, %v130_v23 }
  0x1f   :  { %v132_v25 = vmul.f32 %v227_v22, %v131_v24 }
  0x21   :  { %v133_v26 = vadd.f32 %v227_v22, %v132_v25 }
  0x23   :  { %v135_v27 = vsel %vm134_vm1, %v227_v22, %v133_v26 }
  0x98   :  { %v113_v7 = vpop.f32.mrf.mxu0  ;;  %v116_v9 = vpop.f32.mrf.mxu1 }
  0x99   :  { %v114_v10 = vadd.f32 %v223_v6, %v113_v7  ;;  %v117_v11 = vadd.f32 %v223_v6, %v116_v9 }
  0x9b   :  { %v121_v13 = vadd.f32 %v119_v8, %v114_v10  ;;  %v417_v15 = vadd.f32 %v120_v12, %v117_v11 }
  0x9d   :  { %v123_v14 = vsel %vm89_vm0, %v121_v13, 0.0  ;;  %v138_v16 = vmul.f32 %v121_v13, %v121_v13  ;;  %v139_v18 = vmul.f32 %v417_v15, %v417_v15  ;;  %v126_v19 = vsel %vm89_vm0, %v417_v15, 0.0 }
  0x9e   :  { %124 = vadd.xlane.f32.xlu0 %v123_v14 }
  0x9f   :  { %v140_v17 = vsel %vm89_vm0, %v138_v16, 0.0  ;;  %v143_v20 = vsel %vm89_vm0, %v139_v18, 0.0 }
  0xa0   :  { %141 = vadd.xlane.f32.xlu1 %v140_v17 }
  0xa6   :  { %127 = vadd.xlane.f32.xlu0 %v126_v19 }
  0xa8   :  { %144 = vadd.xlane.f32.xlu1 %v143_v20 }
 0x111   :  { %v125_v28 = vpop.xlane.xlu0 %124 }
 0x112   :  { %v136_v29 = vmul.f32 %v135_v27, %v125_v28 }
 0x113   :  { %v142_v30 = vpop.xlane.xlu1 %141 }
 0x114   :  { %v148_v31 = vmul.f32 %v136_v29, %v136_v29  ;;  %v146_v32 = vmul.f32 %v142_v30, %v135_v27  ;;  %v154_v51 = vsub.f32 %v121_v13, %v136_v29 }
 0x116   :  { %v150_v33 = vsub.f32 %v146_v32, %v148_v31 }
 0x118   :  { %v152_v34 = vmax.f32 %v150_v33, 0.0 }
 0x119   :  { %v128_v35 = vpop.xlane.xlu0 %127 }
 0x11a   :  { %v156_v36 = vadd.f32 1e-05, %v152_v34  ;;  %v137_v37 = vmul.f32 %v135_v27, %v128_v35 }
 0x11b   :  { %v145_v38 = vpop.xlane.xlu1 %144 }
 0x11c   :  { %228 = vrsqrt.f32 %v156_v36  ;;  %v149_v39 = vmul.f32 %v137_v37, %v137_v37  ;;  %v147_v40 = vmul.f32 %v145_v38, %v135_v27  ;;  %vm164_vm3 = vweird.f32 %v156_v36 }
 0x11d   :  { %v155_v63 = vsub.f32 %v417_v15, %v137_v37 }
 0x11e   :  { %v151_v41 = vsub.f32 %v147_v40, %v149_v39 }
 0x120   :  { %v153_v42 = vmax.f32 %v151_v41, 0.0 }
 0x122   :  { %v229_v43 = vpop.eup %228  ;;  %v157_v45 = vadd.f32 1e-05, %v153_v42 }
 0x123   :  { %v159_v44 = vmul.f32 %v229_v43, %v156_v36  ;;  %vm165_vm2 = vweird.f32 %v229_v43 }
 0x124   :  { %230 = vrsqrt.f32 %v157_v45  ;;  %vm166_vm4 = vmor %vm164_vm3, %vm165_vm2  ;;  %vm174_vm6 = vweird.f32 %v157_v45 }
 0x125   :  { %v160_v46 = vmul.f32 %v229_v43, %v159_v44 }
 0x127   :  { %v161_v47 = vmul.f32 0.5, %v160_v46 }
 0x129   :  { %v162_v48 = vsub.f32 1.5, %v161_v47 }
 0x12a   :  { %v231_v49 = vpop.eup %230 }
 0x12b   :  { %v163_v50 = vmul.f32 %v229_v43, %v162_v48  ;;  %v169_v52 = vmul.f32 %v231_v49, %v157_v45  ;;  %vm175_vm5 = vweird.f32 %v231_v49 }
 0x12c   :  { %vm176_vm7 = vmor %vm174_vm6, %vm175_vm5 }
 0x12d   :  { %v167_v54 = vsel %vm166_vm4, %v229_v43, %v163_v50  ;;  %v170_v56 = vmul.f32 %v231_v49, %v169_v52 }
 0x12e   :  { %v178_v55 = vmul.f32 %v167_v54, %v154_v51 }
 0x12f   :  { %v171_v58 = vmul.f32 0.5, %v170_v56 }
 0x130   :  { %v181_v59 = vmul.f32 %v224_v53, %v178_v55 }
 0x131   :  { %v172_v60 = vsub.f32 1.5, %v171_v58 }
 0x132   :  { %v184_v61 = vadd.f32 %v225_v57, %v181_v59 }
 0x133   :  { %v173_v62 = vmul.f32 %v231_v49, %v172_v60 }
 0x134   :  { %186 = vst.msk [vmem:[#allocation10] sm:$0xff] %vm89_vm0, %v184_v61 }
 0x135   :  { %v177_v0 = vsel %vm176_vm7, %v231_v49, %v173_v62 }
 0x136   :  { %v179_v1 = vmul.f32 %v177_v0, %v155_v63 }
 0x138   :  { %v182_v2 = vmul.f32 %v224_v53, %v179_v1 }
 0x13a   :  { %v185_v3 = vadd.f32 %v225_v57, %v182_v2 }
 0x13c   :  { %187 = vst.msk [vmem:[#allocation10 + $0x8] sm:$0xff] %vm89_vm0, %v185_v3 }
 0x13d   :  { %200 = dma.vmem_to_hbm [thread:$0]  %s193_s8, 256, %s195_s11, [#allocation4], %s361_s23, %s361_s23, %s362_s24  }
 0x13e   :  { %358 = dma.done.wait [#allocation4], 256  }
 0x13f   :  { %359 = vsyncadd [#allocation4], 4294967040 }
 0x140   :  { %205 = vsyncpa [#allocation3], 1 }
 0x141   :  { %206 = vsyncpa [#allocation6], 1 }
 0x142   :  { %207 = vsyncpa [#allocation9], 1 }
 0x143   :  { %208 = vsyncpa [#allocation4], 1 }

</bundles_post_ra>
